<compile_context>
chip_gen: v6e
topology: v6e:2x2x1
jax: 0.10.0
libtpu: 0.0.40
codegen_flags: <defaults>
</compile_context>

<pallas_src>
import functools

import jax
import jax.numpy as jnp
from jax import lax
from jax.experimental import pallas as pl
from jax.experimental.pallas import tpu as pltpu

_TARGET_BLOCK_BYTES = 4 << 20   # ~4 MiB per input block (8 MiB HBM read / step)
_VMEM_LIMIT_BYTES = 48 << 20    # > v5e's 16 MiB default scoped limit, < v7x 64 MiB physical


def _choose_lane(total: int):
    """Pick a lane width that divides `total` so the 2D view is a free bitcast."""
    # Prefer multiples of 128 (fully dense vregs).
    for lane in (512, 256, 128):
        if total % lane == 0:
            return lane
    # A block last-dim equal to the full array last-dim is also legal even when
    # not a multiple of 128 (minor lane-padding waste only).
    for lane in range(1024, 127, -1):
        if total % lane == 0:
            return lane
    return None


def _mse_partial_kernel(x_ref, y_ref, o_ref, *, rows, block_rows, lane,
                        n_inner, acc_rows, mask_tail):
    j = pl.program_id(1)

    @pl.when(j == 0)
    def _():
        o_ref[...] = jnp.zeros_like(o_ref)

    d = x_ref[...].astype(jnp.float32) - y_ref[...].astype(jnp.float32)
    sq = d * d

    if mask_tail:
        # Zero rows past the logical end (ragged last block and any clamped /
        # duplicated block on the parallel axis). `rows` is a trace-time const.
        g = pl.program_id(0) * n_inner + j
        row_ids = lax.broadcasted_iota(jnp.int32, (block_rows, lane), 0) + g * block_rows
        sq = jnp.where(row_ids < rows, sq, 0.0)

    # Fold sublane groups into a small resident accumulator. The reshape splits
    # the sublane-major dim at tile boundaries -> layout preserving; the sum is
    # pure VPU adds that hide under the HBM-bound DMA.
    groups = block_rows // acc_rows
    o_ref[...] = o_ref[...] + sq.reshape(groups, acc_rows, lane).sum(axis=0)


def graphcast_loss(invar, outvar, *, num_parallel: int = 2,
                   core_parallel: bool = False,
                   _target_block_bytes: int = _TARGET_BLOCK_BYTES):
    """Pallas implementation of GraphCastLossFunction.forward:
    loss = mean((invar - outvar) ** 2) over all elements of [T, C, H, W]."""
    assert invar.shape == outvar.shape
    total = int(invar.size)
    itemsize = jnp.dtype(invar.dtype).itemsize

    x = jnp.ravel(invar)
    y = jnp.ravel(outvar)

    lane = _choose_lane(total)
    if lane is None:
        # Rare fallback (no divisor >= 128 of the element count): small pad.
        # TODO(synk): manual-DMA tail path would avoid this copy entirely.
        lane = 128
        padded = pl.cdiv(total, lane) * lane
        x = jnp.pad(x, (0, padded - total))
        y = jnp.pad(y, (0, padded - total))
        elems = padded
    else:
        elems = total

    rows = elems // lane
    x = x.reshape(rows, lane)   # rows * lane == elems -> free bitcast reshape
    y = y.reshape(rows, lane)

    # dtype-aware sublane alignment: 8 (f32), 16 (bf16), 32 (8-bit)
    sub_align = max(8, 8 * (4 // itemsize))
    target_rows = max(sub_align,
                      (_target_block_bytes // (lane * itemsize)) // sub_align * sub_align)

    if rows <= target_rows:
        block_rows, n_blocks, num_p, n_inner = rows, 1, 1, 1
    else:
        block_rows = target_rows
        n_blocks = pl.cdiv(rows, block_rows)
        num_p = max(1, min(num_parallel, n_blocks))
        n_inner = pl.cdiv(n_blocks, num_p)

    acc_rows = 8 if block_rows % 8 == 0 else block_rows
    mask_tail = (num_p * n_inner * block_rows) != rows

    if num_p * n_inner > n_blocks:
        # Clamp extra grid points onto the last valid block; they are fully
        # masked to zero inside the kernel, so they only re-read one block.
        in_map = lambda p, j: (jnp.minimum(p * n_inner + j, n_blocks - 1), 0)
    else:
        in_map = lambda p, j: (p * n_inner + j, 0)

    kernel = functools.partial(
        _mse_partial_kernel, rows=rows, block_rows=block_rows, lane=lane,
        n_inner=n_inner, acc_rows=acc_rows, mask_tail=mask_tail)

    first_axis = pltpu.CORE_PARALLEL if core_parallel else "parallel"

    partial = pl.pallas_call(
        kernel,
        out_shape=jax.ShapeDtypeStruct((num_p, acc_rows, lane), jnp.float32),
        grid_spec=pltpu.PrefetchScalarGridSpec(
            num_scalar_prefetch=0,
            grid=(num_p, n_inner),
            in_specs=[
                pl.BlockSpec((block_rows, lane), in_map),
                pl.BlockSpec((block_rows, lane), in_map),
            ],
            # None -> squeezed leading dim: kernel sees a 2D accumulator ref.
            out_specs=pl.BlockSpec((None, acc_rows, lane), lambda p, j: (p, 0, 0)),
        ),
        compiler_params=pltpu.CompilerParams(
            dimension_semantics=(first_axis, "arbitrary"),
            vmem_limit_bytes=_VMEM_LIMIT_BYTES,
        ),
    )(x, y)

    # Single tiny cross-lane/sublane reduction, outside the kernel.
    return jnp.sum(partial) / jnp.float32(total)


if __name__ == "__main__":
    # GraphCastLossFunction.__init__ accepts optional area / channel-weight /
    # time-diff-std metadata, but forward() uses none of it — plain MSE only.
    key = jax.random.PRNGKey(0)
    k1, k2, k3, k4 = jax.random.split(key, 4)

    # Main small test, shapes consistent with [T, C, H, W].
    T, C, H, W = 2, 4, 16, 16
    invar = jax.random.normal(k1, (T, C, H, W), dtype=jnp.float32)
    outvar = jax.random.normal(k2, (T, C, H, W), dtype=jnp.float32)
    loss = jax.block_until_ready(graphcast_loss(invar, outvar))
    ref = jnp.mean((invar - outvar) ** 2)
    assert jnp.allclose(loss, ref, rtol=1e-5, atol=1e-6), (loss, ref)

    # Exercise the ragged-last-block mask path (tiny block size override).
    a = jax.random.normal(k3, (2, 4, 16, 48), dtype=jnp.float32)
    b = jax.random.normal(k4, (2, 4, 16, 48), dtype=jnp.float32)
    l2 = jax.block_until_ready(graphcast_loss(a, b, _target_block_bytes=8 * 512 * 4))
    r2 = jnp.mean((a - b) ** 2)
    assert jnp.allclose(l2, r2, rtol=1e-5, atol=1e-6), (l2, r2)

    # Exercise the clamped-duplicate-block path (n_blocks=3, num_parallel=2).
    a3 = jax.random.normal(k1, (2, 4, 16, 80), dtype=jnp.float32)
    b3 = jax.random.normal(k2, (2, 4, 16, 80), dtype=jnp.float32)
    l3 = jax.block_until_ready(graphcast_loss(a3, b3, _target_block_bytes=8 * 512 * 4))
    r3 = jnp.mean((a3 - b3) ** 2)
    assert jnp.allclose(l3, r3, rtol=1e-5, atol=1e-6), (l3, r3)

    # bf16 inputs (upcast to f32 inside the kernel).
    ab = jax.random.normal(k3, (2, 4, 64, 64), dtype=jnp.bfloat16)
    bb = jax.random.normal(k4, (2, 4, 64, 64), dtype=jnp.bfloat16)
    lb = jax.block_until_ready(graphcast_loss(ab, bb))
    rb = jnp.mean((ab.astype(jnp.float32) - bb.astype(jnp.float32)) ** 2)
    assert jnp.allclose(lb, rb, rtol=1e-4, atol=1e-5), (lb, rb)

    print("KERNEL_OK")
</pallas_src>

<mosaic_0001>
module attributes {stable_mosaic.version = 11 : i64} {
  func.func @_mse_partial_kernel(%arg0: i32, %arg1: i32, %arg2: memref<4x512xf32, #tpu.memory_space<vmem>>, %arg3: memref<4x512xf32, #tpu.memory_space<vmem>>, %arg4: memref<1x4x512xf32, #tpu.memory_space<vmem>>) attributes {dimension_semantics = [#tpu.dimension_semantics<parallel>, #tpu.dimension_semantics<arbitrary>], iteration_bounds = array<i64: 1, 1>, scalar_prefetch = 0 : i64, scratch_operands = 0 : i64, tpu.core_type = #tpu.core_type<tc>, window_params = [{transform_indices = @transform_0, window_bounds = array<i64: 4, 512>}, {transform_indices = @transform_1, window_bounds = array<i64: 4, 512>}, {transform_indices = @transform_2, window_bounds = array<i64: 1, 4, 512>}]} {
    %c0_i32 = arith.constant 0 : i32
    %0 = arith.cmpi eq, %arg1, %c0_i32 : i32
    %1 = arith.extui %0 : i1 to i32
    %c0_i32_0 = arith.constant 0 : i32
    %2 = arith.cmpi ne, %1, %c0_i32_0 : i32
    scf.if %2 {
      %cst_10 = arith.constant 0.000000e+00 : f32
      %15 = vector.broadcast %cst_10 : f32 to vector<4x512xf32>
      %c0_11 = arith.constant 0 : index
      %c0_12 = arith.constant 0 : index
      %c0_13 = arith.constant 0 : index
      %16 = vector.load %arg4[%c0_11, %c0_12, %c0_13] : memref<1x4x512xf32, #tpu.memory_space<vmem>>, vector<1x4x512xf32>
      %17 = vector.shape_cast %16 : vector<1x4x512xf32> to vector<4x512xf32>
      %18 = vector.shape_cast %15 : vector<4x512xf32> to vector<1x4x512xf32>
      tpu.vector_store %arg4[%c0_11, %c0_12, %c0_13], %18 {strides = array<i32>} : memref<1x4x512xf32, #tpu.memory_space<vmem>>, vector<1x4x512xf32>,
    } else {
    }
    %c0 = arith.constant 0 : index
    %c0_1 = arith.constant 0 : index
    %3 = vector.load %arg2[%c0, %c0_1] : memref<4x512xf32, #tpu.memory_space<vmem>>, vector<4x512xf32>
    %c0_2 = arith.constant 0 : index
    %c0_3 = arith.constant 0 : index
    %4 = vector.load %arg3[%c0_2, %c0_3] : memref<4x512xf32, #tpu.memory_space<vmem>>, vector<4x512xf32>
    %5 = arith.subf %3, %4 : vector<4x512xf32>
    %6 = arith.mulf %5, %5 : vector<4x512xf32>
    %c0_4 = arith.constant 0 : index
    %c0_5 = arith.constant 0 : index
    %c0_6 = arith.constant 0 : index
    %7 = vector.load %arg4[%c0_4, %c0_5, %c0_6] : memref<1x4x512xf32, #tpu.memory_space<vmem>>, vector<1x4x512xf32>
    %8 = vector.shape_cast %7 : vector<1x4x512xf32> to vector<4x512xf32>
    %9 = vector.shape_cast %6 : vector<4x512xf32> to vector<1x4x512xf32>
    %cst = arith.constant dense<0.000000e+00> : vector<4x512xf32>
    %10 = vector.multi_reduction <add>, %9, %cst [0] : vector<1x4x512xf32> to vector<4x512xf32>
    %11 = arith.addf %8, %10 : vector<4x512xf32>
    %c0_7 = arith.constant 0 : index
    %c0_8 = arith.constant 0 : index
    %c0_9 = arith.constant 0 : index
    %12 = vector.load %arg4[%c0_7, %c0_8, %c0_9] : memref<1x4x512xf32, #tpu.memory_space<vmem>>, vector<1x4x512xf32>
    %13 = vector.shape_cast %12 : vector<1x4x512xf32> to vector<4x512xf32>
    %14 = vector.shape_cast %11 : vector<4x512xf32> to vector<1x4x512xf32>
    tpu.vector_store %arg4[%c0_7, %c0_8, %c0_9], %14 {strides = array<i32>} : memref<1x4x512xf32, #tpu.memory_space<vmem>>, vector<1x4x512xf32>,
    return
  }
  func.func @transform_0(%arg0: i32, %arg1: i32) -> (i32, i32) {
    %c1_i32 = arith.constant 1 : i32
    %0 = arith.muli %arg0, %c1_i32 : i32
    %1 = arith.addi %0, %arg1 : i32
    %c0_i32 = arith.constant 0 : i32
    %c0_i32_0 = arith.constant 0 : i32
    return %1, %c0_i32 : i32, i32
  }
  func.func @transform_1(%arg0: i32, %arg1: i32) -> (i32, i32) {
    %c1_i32 = arith.constant 1 : i32
    %0 = arith.muli %arg0, %c1_i32 : i32
    %1 = arith.addi %0, %arg1 : i32
    %c0_i32 = arith.constant 0 : i32
    %c0_i32_0 = arith.constant 0 : i32
    return %1, %c0_i32 : i32, i32
  }
  func.func @transform_2(%arg0: i32, %arg1: i32) -> (i32, i32, i32) {
    %c0_i32 = arith.constant 0 : i32
    %c0_i32_0 = arith.constant 0 : i32
    %c0_i32_1 = arith.constant 0 : i32
    return %arg0, %c0_i32, %c0_i32_0 : i32, i32, i32
  }
}

</mosaic_0001>

<bundles_post_ra>
// kernel: tpu_custom_call.1
= control target key start
LH: loop header
LB: loop body
LE: loop exit
PB: predicated region body
PF: predicated region fallthrough
CT: control target
= control target key end

     0   :  { %7 = vsyncpa [#allocation3], 0  ;;  %s181_s0 = inlined_call_operand.hbm [shape: f32[4,512], index: 0, kind: input, shape index: {}]   ;;  %s182_s1 = inlined_call_operand.hbm [shape: f32[4,512], index: 1, kind: input, shape index: {}]   ;;  %s183_s2 = inlined_call_operand.hbm [shape: f32[1,4,512], index: 2, kind: output, shape index: {}]  }
   0x1   :  { %8 = vsyncpa [#allocation6], 0 }
   0x2   :  { %9 = vsyncpa [#allocation4], 0  ;;  %s154_s9 = smov [#allocation2]   ;;  %s155_s11 = smov [#allocation5]  }
   0x3   :  { %s20_s10 = sshll.u32 %s154_s9, 4  ;;  %s34_s12 = sshll.u32 %s155_s11, 4  ;;  %s21_s10 = int_to_ptr.vmem [resolvable:$true] %s20_s10  ;;  %s35_s12 = int_to_ptr.vmem [resolvable:$true] %s34_s12 }
   0x4   :  { %s96_s13 = scalar_lea.vmem %s21_s10, 256  ;;  %p101_p1 = scmp.lt.s32.totalorder %s21_s10, %s21_s10 }
   0x5   :  { %p97_p0 = scmp.ne.s32.totalorder %s21_s10, %s96_s13  ;;  %p102_p2 = scmp.lt.s32.totalorder %s96_s13, %s96_s13 }
   0x7   :  { %p103_p3 = por %p102_p2, %p101_p1 }
   0x9   :  { %p104_p4 = pnand %p103_p3, %p97_p0 }
   0xb   :  { %107 = shalt.err (!%p104_p4)
}
   0xc   :  { %23 = dma.hbm_to_vmem [thread:$0]  %s181_s0, 256, %s21_s10, [#allocation3]  }
   0xd   :  { %s116_s16 = scalar_lea.vmem %s35_s12, 256  ;;  %p121_p6 = scmp.lt.s32.totalorder %s35_s12, %s35_s12 }
   0xe   :  { %p117_p5 = scmp.ne.s32.totalorder %s35_s12, %s116_s16  ;;  %p122_p7 = scmp.lt.s32.totalorder %s116_s16, %s116_s16 }
  0x10   :  { %p123_p8 = por %p122_p7, %p121_p6 }
  0x12   :  { %p124_p9 = pnand %p123_p8, %p117_p5 }
  0x14   :  { %127 = shalt.err (!%p124_p9)
}
  0x15   :  { %37 = dma.hbm_to_vmem [thread:$0]  %s182_s1, 256, %s35_s12, [#allocation6]  }
  0x16   :  { %148 = dma.done.wait [#allocation3], 256  }
  0x17   :  { %149 = vsyncadd [#allocation3], 4294967040 }
  0x18   :  { %150 = dma.done.wait [#allocation6], 256  }
  0x19   :  { %151 = vsyncadd [#allocation6], 4294967040  ;;  %v52_v0 = vld [vmem:[#allocation2] sm:$0xff]  ;;  %v54_v1 = vld [vmem:[#allocation5] sm:$0xff]  ;;  %s156_s0 = smov [#allocation7]  }
  0x1a   :  { %v53_v2 = vld [vmem:[#allocation2 + $0x8] sm:$0xff]  ;;  %v56_v3 = vsub.f32 %v52_v0, %v54_v1  ;;  %v55_v4 = vld [vmem:[#allocation5 + $0x8] sm:$0xff]  ;;  %s74_s19 = sshll.u32 %s156_s0, 4  ;;  %s75_s19 = int_to_ptr.vmem [resolvable:$true] %s74_s19 }
  0x1b   :  { %v57_v5 = vsub.f32 %v53_v2, %v55_v4  ;;  %s128_s20 = scalar_lea.vmem %s75_s19, 256  ;;  %p133_p11 = scmp.lt.s32.totalorder %s75_s19, %s75_s19 }
  0x1c   :  { %v58_v6 = vmul.f32 %v56_v3, %v56_v3  ;;  %p129_p10 = scmp.ne.s32.totalorder %s75_s19, %s128_s20  ;;  %p134_p12 = scmp.lt.s32.totalorder %s128_s20, %s128_s20 }
  0x1d   :  { %v59_v7 = vmul.f32 %v57_v5, %v57_v5 }
  0x1e   :  { %66 = vst [vmem:[#allocation7] sm:$0xff] %v58_v6  ;;  %p135_p13 = por %p134_p12, %p133_p11 }
  0x1f   :  { %67 = vst [vmem:[#allocation7 + $0x8] sm:$0xff] %v59_v7 }
  0x20   :  { %p136_p0 = pnand %p135_p13, %p129_p10 }
  0x22   :  { %139 = shalt.err (!%p136_p0)
}
  0x23   :  { %77 = dma.vmem_to_hbm [thread:$0]  %s75_s19, 256, %s183_s2, [#allocation4]  }
  0x24   :  { %152 = dma.done.wait [#allocation4], 256  }
  0x25   :  { %153 = vsyncadd [#allocation4], 4294967040 }
  0x26   :  { %81 = vsyncpa [#allocation3], 1 }
  0x27   :  { %82 = vsyncpa [#allocation6], 1 }
  0x28   :  { %83 = vsyncpa [#allocation4], 1 }

</bundles_post_ra>
